<compile_context>
chip_gen: v5e
topology: v5e:2x2
jax: 0.10.0
libtpu: 0.0.40
codegen_flags: <defaults>
</compile_context>

<pallas_src>
import functools

import jax
import jax.numpy as jnp
from jax.experimental import pallas as pl
from jax.experimental.pallas import tpu as pltpu

IN_FEATURES = 4
HIDDEN_LAYER = 4
OUT_FEATURES = 2

LANE = 128                     # TPU lane width
SUBLANE = 8                    # f32 sublanes per vreg
MIN_TILE = LANE * SUBLANE      # 1024 batch elements: one full vreg of batch
MAX_TILE = 128 * 1024          # keep double-buffered VMEM well under v5e/v7x limits


def _round_up(n, m):
    return ((n + m - 1) // m) * m


def qnetwork_kernel(x_ref, w1_ref, b1_ref, w2_ref, b2_ref, out_ref):
    """One batch tile (batch folded onto sublane x lane axes).

    x_ref   : [IN_FEATURES, S, LANE]  f32 VMEM (full-vreg batch tiles, pipelined)
    w1_ref  : [IN_FEATURES*HIDDEN_LAYER] f32 SMEM (row-major over [in, out])
    b1_ref  : [HIDDEN_LAYER]          f32 SMEM
    w2_ref  : [HIDDEN_LAYER*OUT_FEATURES] f32 SMEM (row-major over [in, out])
    b2_ref  : [OUT_FEATURES]          f32 SMEM
    out_ref : [OUT_FEATURES, S, LANE] f32 VMEM
    """
    # Each feature row is a full [S, LANE] slab -> 100% sublane/lane occupancy.
    x = [x_ref[k] for k in range(IN_FEATURES)]

    # ---- Layer 1 + sigmoid: h[j] = sigmoid(b1[j] + sum_k w1[k,j] * x[k]) ----
    # Unrolled scalar-broadcast FMAs on the VPU; no MXU for a 4x4 matmul.
    h = []
    for j in range(HIDDEN_LAYER):
        acc = x[0] * w1_ref[0 * HIDDEN_LAYER + j]
        for k in range(1, IN_FEATURES):
            acc = acc + x[k] * w1_ref[k * HIDDEN_LAYER + j]
        z = acc + b1_ref[j]
        # sigmoid(z) == 0.5 * (1 + tanh(0.5*z)): one EUP transcendental per element.
        h.append(0.5 * (1.0 + jnp.tanh(0.5 * z)))

    # ---- Layer 2: two logit slabs ----
    def logit(c):
        acc = h[0] * w2_ref[0 * OUT_FEATURES + c]
        for j in range(1, HIDDEN_LAYER):
            acc = acc + h[j] * w2_ref[j * OUT_FEATURES + c]
        return acc + b2_ref[c]

    l0 = logit(0)
    l1 = logit(1)

    # ---- 2-class log_softmax (no cross-lane reduce):
    #   out0 = -softplus(l1 - l0),  out1 = (l1 - l0) - softplus(l1 - l0)
    d = l1 - l0
    sp = jnp.maximum(d, 0.0) + jnp.log1p(jnp.exp(-jnp.abs(d)))  # stable softplus(d)
    out_ref[0] = -sp
    out_ref[1] = d - sp


def _pick_tile(B, batch_tile):
    """Batch elements per grid step: multiple of 8*128, capped, >=2 steps if possible."""
    bt = min(_round_up(max(int(batch_tile), 1), MIN_TILE), MAX_TILE)
    if B > 2 * MIN_TILE:
        # Keep at least two grid steps so the "parallel" axis can shard across
        # the two v7x TensorCores.
        bt = min(bt, _round_up((B + 1) // 2, MIN_TILE))
    bt = min(bt, _round_up(B, MIN_TILE))
    return bt


@functools.partial(jax.jit, static_argnames=("batch_tile",))
def qnetwork_forward_lane_major(x_lm, w1, b1, w2, b2, *, batch_tile=64 * 1024):
    """Lane-major entry point (no boundary transposes).

    x_lm: [IN_FEATURES, B] f32.  w1: [4, H], b1: [H], w2: [H, 2], b2: [2].
    Returns [OUT_FEATURES, B] f32 log-probabilities.
    """
    B = x_lm.shape[1]
    bt = _pick_tile(B, batch_tile)
    B_pad = _round_up(B, bt)

    if B_pad != B:
        x_lm = jnp.pad(x_lm, ((0, 0), (0, B_pad - B)))

    n_cols = B_pad // LANE          # 128-lane columns
    S = bt // LANE                  # sublane-rows per grid step (multiple of 8)
    grid = (n_cols // S,)

    # Free (contiguous) reshape: fold batch onto (sublane, lane) axes.
    x3 = x_lm.reshape(IN_FEATURES, n_cols, LANE)

    out3 = pl.pallas_call(
        qnetwork_kernel,
        out_shape=jax.ShapeDtypeStruct((OUT_FEATURES, n_cols, LANE), jnp.float32),
        grid=grid,
        in_specs=[
            # x: pipelined, full-vreg batch tiles.
            pl.BlockSpec((IN_FEATURES, S, LANE), lambda i: (0, i, 0)),
            # Weights / biases: ~120 bytes total, resident in SMEM for the whole
            # call (no per-step DMA, cheap scalar reads).
            pl.BlockSpec(memory_space=pltpu.MemorySpace.SMEM),  # w1 flat [16]
            pl.BlockSpec(memory_space=pltpu.MemorySpace.SMEM),  # b1 [4]
            pl.BlockSpec(memory_space=pltpu.MemorySpace.SMEM),  # w2 flat [8]
            pl.BlockSpec(memory_space=pltpu.MemorySpace.SMEM),  # b2 [2]
        ],
        out_specs=pl.BlockSpec((OUT_FEATURES, S, LANE), lambda i: (0, i, 0)),
        compiler_params=pltpu.CompilerParams(
            dimension_semantics=("parallel",),  # megacore-shardable batch axis
        ),
    )(x3, w1.reshape(-1), b1.reshape(-1), w2.reshape(-1), b2.reshape(-1))

    return out3.reshape(OUT_FEATURES, B_pad)[:, :B]


@jax.jit
def _qnetwork_jnp(x, w1, b1, w2, b2):
    """Pure-jnp path (tiny batches: pallas fixed cost + layout plumbing dominate)."""
    h = jax.nn.sigmoid(x @ w1 + b1)
    return jax.nn.log_softmax(h @ w2 + b2, axis=-1)


def qnetwork_forward(x, w1, b1, w2, b2, *, batch_tile=64 * 1024, min_kernel_batch=1024):
    """PyTorch-convention wrapper. x: [B, 4] f32 -> [B, 2] log-probabilities."""
    B = x.shape[0]
    if B < min_kernel_batch:
        return _qnetwork_jnp(x, w1, b1, w2, b2)
    # One boundary transpose each way; for large B this is small next to kernel
    # traffic, and callers who can produce lane-major data should use
    # qnetwork_forward_lane_major directly.
    out_lm = qnetwork_forward_lane_major(x.T, w1, b1, w2, b2, batch_tile=batch_tile)
    return out_lm.T


def init_params(key):
    """Deterministic init matching PyTorch nn.Linear (weight: [out, in], U(-1/sqrt(fan_in), ..))."""
    k1, k2, k3, k4 = jax.random.split(key, 4)
    bound1 = 1.0 / jnp.sqrt(IN_FEATURES)
    bound2 = 1.0 / jnp.sqrt(HIDDEN_LAYER)
    w1_torch = jax.random.uniform(k1, (HIDDEN_LAYER, IN_FEATURES), jnp.float32, -bound1, bound1)
    b1 = jax.random.uniform(k2, (HIDDEN_LAYER,), jnp.float32, -bound1, bound1)
    w2_torch = jax.random.uniform(k3, (OUT_FEATURES, HIDDEN_LAYER), jnp.float32, -bound2, bound2)
    b2 = jax.random.uniform(k4, (OUT_FEATURES,), jnp.float32, -bound2, bound2)
    # Transpose to [in, out] so the math is x @ W + b.
    return w1_torch.T, b1, w2_torch.T, b2


def reference_forward(x, w1, b1, w2, b2):
    h = jax.nn.sigmoid(x @ w1 + b1)
    logits = h @ w2 + b2
    return jax.nn.log_softmax(logits, axis=-1)


if __name__ == "__main__":
    key = jax.random.PRNGKey(0)
    k_param, k_x1, k_x2 = jax.random.split(key, 3)
    w1, b1, w2, b2 = init_params(k_param)

    # 1) Small demo batch (module's typical usage): force the kernel path via the
    #    lane-major API so the Pallas kernel itself is exercised at B=2.
    x_small = jax.random.normal(k_x1, (2, IN_FEATURES), jnp.float32)
    out_small = jax.block_until_ready(
        qnetwork_forward_lane_major(x_small.T, w1, b1, w2, b2).T)
    ref_small = reference_forward(x_small, w1, b1, w2, b2)
    assert out_small.shape == (2, OUT_FEATURES)
    assert jnp.allclose(out_small, ref_small, atol=1e-5, rtol=1e-5), "mismatch (B=2, kernel)"

    # 1b) Same small batch through the convenience wrapper (tiny-batch jnp fallback).
    out_small_w = jax.block_until_ready(qnetwork_forward(x_small, w1, b1, w2, b2))
    assert jnp.allclose(out_small_w, ref_small, atol=1e-5, rtol=1e-5), "mismatch (B=2, fallback)"

    # 2) Larger, non-multiple-of-tile batch: exercises grid (>=2 steps), batch padding,
    #    and the tile-size rounding guard (batch_tile=1000 -> rounded up to 1024).
    x_big = jax.random.normal(k_x2, (3000, IN_FEATURES), jnp.float32)
    out_big = jax.block_until_ready(
        qnetwork_forward(x_big, w1, b1, w2, b2, batch_tile=1000))
    ref_big = reference_forward(x_big, w1, b1, w2, b2)
    assert out_big.shape == (3000, OUT_FEATURES)
    assert jnp.allclose(out_big, ref_big, atol=1e-5, rtol=1e-5), "mismatch (B=3000)"

    print("KERNEL_OK")
</pallas_src>

<mosaic_0001>
module attributes {stable_mosaic.version = 11 : i64} {
  func.func @qnetwork_kernel(%arg0: i32, %arg1: memref<4x8x128xf32, #tpu.memory_space<vmem>>, %arg2: memref<16xf32, #tpu.memory_space<smem>>, %arg3: memref<4xf32, #tpu.memory_space<smem>>, %arg4: memref<8xf32, #tpu.memory_space<smem>>, %arg5: memref<2xf32, #tpu.memory_space<smem>>, %arg6: memref<2x8x128xf32, #tpu.memory_space<vmem>>) attributes {dimension_semantics = [#tpu.dimension_semantics<parallel>], iteration_bounds = array<i64: 1>, scalar_prefetch = 0 : i64, scratch_operands = 0 : i64, tpu.core_type = #tpu.core_type<tc>, window_params = [{transform_indices = @transform_0, window_bounds = array<i64: 4, 8, 128>}, {transform_indices = @transform_1, window_bounds = array<i64: 16>}, {transform_indices = @transform_2, window_bounds = array<i64: 4>}, {transform_indices = @transform_3, window_bounds = array<i64: 8>}, {transform_indices = @transform_4, window_bounds = array<i64: 2>}, {transform_indices = @transform_5, window_bounds = array<i64: 2, 8, 128>}]} {
    %c0 = arith.constant 0 : index
    %c0_0 = arith.constant 0 : index
    %c0_1 = arith.constant 0 : index
    %0 = vector.load %arg1[%c0, %c0_0, %c0_1] : memref<4x8x128xf32, #tpu.memory_space<vmem>>, vector<1x8x128xf32>
    %1 = vector.shape_cast %0 : vector<1x8x128xf32> to vector<8x128xf32>
    %c1 = arith.constant 1 : index
    %c0_2 = arith.constant 0 : index
    %c0_3 = arith.constant 0 : index
    %2 = vector.load %arg1[%c1, %c0_2, %c0_3] : memref<4x8x128xf32, #tpu.memory_space<vmem>>, vector<1x8x128xf32>
    %3 = vector.shape_cast %2 : vector<1x8x128xf32> to vector<8x128xf32>
    %c2 = arith.constant 2 : index
    %c0_4 = arith.constant 0 : index
    %c0_5 = arith.constant 0 : index
    %4 = vector.load %arg1[%c2, %c0_4, %c0_5] : memref<4x8x128xf32, #tpu.memory_space<vmem>>, vector<1x8x128xf32>
    %5 = vector.shape_cast %4 : vector<1x8x128xf32> to vector<8x128xf32>
    %c3 = arith.constant 3 : index
    %c0_6 = arith.constant 0 : index
    %c0_7 = arith.constant 0 : index
    %6 = vector.load %arg1[%c3, %c0_6, %c0_7] : memref<4x8x128xf32, #tpu.memory_space<vmem>>, vector<1x8x128xf32>
    %7 = vector.shape_cast %6 : vector<1x8x128xf32> to vector<8x128xf32>
    %c0_8 = arith.constant 0 : index
    %8 = memref.load %arg2[%c0_8] : memref<16xf32, #tpu.memory_space<smem>>
    %9 = vector.broadcast %8 : f32 to vector<8x128xf32>
    %10 = arith.mulf %1, %9 : vector<8x128xf32>
    %c4 = arith.constant 4 : index
    %11 = memref.load %arg2[%c4] : memref<16xf32, #tpu.memory_space<smem>>
    %12 = vector.broadcast %11 : f32 to vector<8x128xf32>
    %13 = arith.mulf %3, %12 : vector<8x128xf32>
    %14 = arith.addf %10, %13 : vector<8x128xf32>
    %c8 = arith.constant 8 : index
    %15 = memref.load %arg2[%c8] : memref<16xf32, #tpu.memory_space<smem>>
    %16 = vector.broadcast %15 : f32 to vector<8x128xf32>
    %17 = arith.mulf %5, %16 : vector<8x128xf32>
    %18 = arith.addf %14, %17 : vector<8x128xf32>
    %c12 = arith.constant 12 : index
    %19 = memref.load %arg2[%c12] : memref<16xf32, #tpu.memory_space<smem>>
    %20 = vector.broadcast %19 : f32 to vector<8x128xf32>
    %21 = arith.mulf %7, %20 : vector<8x128xf32>
    %22 = arith.addf %18, %21 : vector<8x128xf32>
    %c0_9 = arith.constant 0 : index
    %23 = memref.load %arg3[%c0_9] : memref<4xf32, #tpu.memory_space<smem>>
    %24 = vector.broadcast %23 : f32 to vector<8x128xf32>
    %25 = arith.addf %22, %24 : vector<8x128xf32>
    %cst = arith.constant 5.000000e-01 : f32
    %26 = vector.broadcast %cst : f32 to vector<8x128xf32>
    %27 = arith.mulf %26, %25 : vector<8x128xf32>
    %28 = math.tanh %27 : vector<8x128xf32>
    %cst_10 = arith.constant 1.000000e+00 : f32
    %29 = vector.broadcast %cst_10 : f32 to vector<8x128xf32>
    %30 = arith.addf %29, %28 : vector<8x128xf32>
    %cst_11 = arith.constant 5.000000e-01 : f32
    %31 = vector.broadcast %cst_11 : f32 to vector<8x128xf32>
    %32 = arith.mulf %31, %30 : vector<8x128xf32>
    %c1_12 = arith.constant 1 : index
    %33 = memref.load %arg2[%c1_12] : memref<16xf32, #tpu.memory_space<smem>>
    %34 = vector.broadcast %33 : f32 to vector<8x128xf32>
    %35 = arith.mulf %1, %34 : vector<8x128xf32>
    %c5 = arith.constant 5 : index
    %36 = memref.load %arg2[%c5] : memref<16xf32, #tpu.memory_space<smem>>
    %37 = vector.broadcast %36 : f32 to vector<8x128xf32>
    %38 = arith.mulf %3, %37 : vector<8x128xf32>
    %39 = arith.addf %35, %38 : vector<8x128xf32>
    %c9 = arith.constant 9 : index
    %40 = memref.load %arg2[%c9] : memref<16xf32, #tpu.memory_space<smem>>
    %41 = vector.broadcast %40 : f32 to vector<8x128xf32>
    %42 = arith.mulf %5, %41 : vector<8x128xf32>
    %43 = arith.addf %39, %42 : vector<8x128xf32>
    %c13 = arith.constant 13 : index
    %44 = memref.load %arg2[%c13] : memref<16xf32, #tpu.memory_space<smem>>
    %45 = vector.broadcast %44 : f32 to vector<8x128xf32>
    %46 = arith.mulf %7, %45 : vector<8x128xf32>
    %47 = arith.addf %43, %46 : vector<8x128xf32>
    %c1_13 = arith.constant 1 : index
    %48 = memref.load %arg3[%c1_13] : memref<4xf32, #tpu.memory_space<smem>>
    %49 = vector.broadcast %48 : f32 to vector<8x128xf32>
    %50 = arith.addf %47, %49 : vector<8x128xf32>
    %cst_14 = arith.constant 5.000000e-01 : f32
    %51 = vector.broadcast %cst_14 : f32 to vector<8x128xf32>
    %52 = arith.mulf %51, %50 : vector<8x128xf32>
    %53 = math.tanh %52 : vector<8x128xf32>
    %cst_15 = arith.constant 1.000000e+00 : f32
    %54 = vector.broadcast %cst_15 : f32 to vector<8x128xf32>
    %55 = arith.addf %54, %53 : vector<8x128xf32>
    %cst_16 = arith.constant 5.000000e-01 : f32
    %56 = vector.broadcast %cst_16 : f32 to vector<8x128xf32>
    %57 = arith.mulf %56, %55 : vector<8x128xf32>
    %c2_17 = arith.constant 2 : index
    %58 = memref.load %arg2[%c2_17] : memref<16xf32, #tpu.memory_space<smem>>
    %59 = vector.broadcast %58 : f32 to vector<8x128xf32>
    %60 = arith.mulf %1, %59 : vector<8x128xf32>
    %c6 = arith.constant 6 : index
    %61 = memref.load %arg2[%c6] : memref<16xf32, #tpu.memory_space<smem>>
    %62 = vector.broadcast %61 : f32 to vector<8x128xf32>
    %63 = arith.mulf %3, %62 : vector<8x128xf32>
    %64 = arith.addf %60, %63 : vector<8x128xf32>
    %c10 = arith.constant 10 : index
    %65 = memref.load %arg2[%c10] : memref<16xf32, #tpu.memory_space<smem>>
    %66 = vector.broadcast %65 : f32 to vector<8x128xf32>
    %67 = arith.mulf %5, %66 : vector<8x128xf32>
    %68 = arith.addf %64, %67 : vector<8x128xf32>
    %c14 = arith.constant 14 : index
    %69 = memref.load %arg2[%c14] : memref<16xf32, #tpu.memory_space<smem>>
    %70 = vector.broadcast %69 : f32 to vector<8x128xf32>
    %71 = arith.mulf %7, %70 : vector<8x128xf32>
    %72 = arith.addf %68, %71 : vector<8x128xf32>
    %c2_18 = arith.constant 2 : index
    %73 = memref.load %arg3[%c2_18] : memref<4xf32, #tpu.memory_space<smem>>
    %74 = vector.broadcast %73 : f32 to vector<8x128xf32>
    %75 = arith.addf %72, %74 : vector<8x128xf32>
    %cst_19 = arith.constant 5.000000e-01 : f32
    %76 = vector.broadcast %cst_19 : f32 to vector<8x128xf32>
    %77 = arith.mulf %76, %75 : vector<8x128xf32>
    %78 = math.tanh %77 : vector<8x128xf32>
    %cst_20 = arith.constant 1.000000e+00 : f32
    %79 = vector.broadcast %cst_20 : f32 to vector<8x128xf32>
    %80 = arith.addf %79, %78 : vector<8x128xf32>
    %cst_21 = arith.constant 5.000000e-01 : f32
    %81 = vector.broadcast %cst_21 : f32 to vector<8x128xf32>
    %82 = arith.mulf %81, %80 : vector<8x128xf32>
    %c3_22 = arith.constant 3 : index
    %83 = memref.load %arg2[%c3_22] : memref<16xf32, #tpu.memory_space<smem>>
    %84 = vector.broadcast %83 : f32 to vector<8x128xf32>
    %85 = arith.mulf %1, %84 : vector<8x128xf32>
    %c7 = arith.constant 7 : index
    %86 = memref.load %arg2[%c7] : memref<16xf32, #tpu.memory_space<smem>>
    %87 = vector.broadcast %86 : f32 to vector<8x128xf32>
    %88 = arith.mulf %3, %87 : vector<8x128xf32>
    %89 = arith.addf %85, %88 : vector<8x128xf32>
    %c11 = arith.constant 11 : index
    %90 = memref.load %arg2[%c11] : memref<16xf32, #tpu.memory_space<smem>>
    %91 = vector.broadcast %90 : f32 to vector<8x128xf32>
    %92 = arith.mulf %5, %91 : vector<8x128xf32>
    %93 = arith.addf %89, %92 : vector<8x128xf32>
    %c15 = arith.constant 15 : index
    %94 = memref.load %arg2[%c15] : memref<16xf32, #tpu.memory_space<smem>>
    %95 = vector.broadcast %94 : f32 to vector<8x128xf32>
    %96 = arith.mulf %7, %95 : vector<8x128xf32>
    %97 = arith.addf %93, %96 : vector<8x128xf32>
    %c3_23 = arith.constant 3 : index
    %98 = memref.load %arg3[%c3_23] : memref<4xf32, #tpu.memory_space<smem>>
    %99 = vector.broadcast %98 : f32 to vector<8x128xf32>
    %100 = arith.addf %97, %99 : vector<8x128xf32>
    %cst_24 = arith.constant 5.000000e-01 : f32
    %101 = vector.broadcast %cst_24 : f32 to vector<8x128xf32>
    %102 = arith.mulf %101, %100 : vector<8x128xf32>
    %103 = math.tanh %102 : vector<8x128xf32>
    %cst_25 = arith.constant 1.000000e+00 : f32
    %104 = vector.broadcast %cst_25 : f32 to vector<8x128xf32>
    %105 = arith.addf %104, %103 : vector<8x128xf32>
    %cst_26 = arith.constant 5.000000e-01 : f32
    %106 = vector.broadcast %cst_26 : f32 to vector<8x128xf32>
    %107 = arith.mulf %106, %105 : vector<8x128xf32>
    %c0_27 = arith.constant 0 : index
    %108 = memref.load %arg4[%c0_27] : memref<8xf32, #tpu.memory_space<smem>>
    %109 = vector.broadcast %108 : f32 to vector<8x128xf32>
    %110 = arith.mulf %32, %109 : vector<8x128xf32>
    %c2_28 = arith.constant 2 : index
    %111 = memref.load %arg4[%c2_28] : memref<8xf32, #tpu.memory_space<smem>>
    %112 = vector.broadcast %111 : f32 to vector<8x128xf32>
    %113 = arith.mulf %57, %112 : vector<8x128xf32>
    %114 = arith.addf %110, %113 : vector<8x128xf32>
    %c4_29 = arith.constant 4 : index
    %115 = memref.load %arg4[%c4_29] : memref<8xf32, #tpu.memory_space<smem>>
    %116 = vector.broadcast %115 : f32 to vector<8x128xf32>
    %117 = arith.mulf %82, %116 : vector<8x128xf32>
    %118 = arith.addf %114, %117 : vector<8x128xf32>
    %c6_30 = arith.constant 6 : index
    %119 = memref.load %arg4[%c6_30] : memref<8xf32, #tpu.memory_space<smem>>
    %120 = vector.broadcast %119 : f32 to vector<8x128xf32>
    %121 = arith.mulf %107, %120 : vector<8x128xf32>
    %122 = arith.addf %118, %121 : vector<8x128xf32>
    %c0_31 = arith.constant 0 : index
    %123 = memref.load %arg5[%c0_31] : memref<2xf32, #tpu.memory_space<smem>>
    %124 = vector.broadcast %123 : f32 to vector<8x128xf32>
    %125 = arith.addf %122, %124 : vector<8x128xf32>
    %c1_32 = arith.constant 1 : index
    %126 = memref.load %arg4[%c1_32] : memref<8xf32, #tpu.memory_space<smem>>
    %127 = vector.broadcast %126 : f32 to vector<8x128xf32>
    %128 = arith.mulf %32, %127 : vector<8x128xf32>
    %c3_33 = arith.constant 3 : index
    %129 = memref.load %arg4[%c3_33] : memref<8xf32, #tpu.memory_space<smem>>
    %130 = vector.broadcast %129 : f32 to vector<8x128xf32>
    %131 = arith.mulf %57, %130 : vector<8x128xf32>
    %132 = arith.addf %128, %131 : vector<8x128xf32>
    %c5_34 = arith.constant 5 : index
    %133 = memref.load %arg4[%c5_34] : memref<8xf32, #tpu.memory_space<smem>>
    %134 = vector.broadcast %133 : f32 to vector<8x128xf32>
    %135 = arith.mulf %82, %134 : vector<8x128xf32>
    %136 = arith.addf %132, %135 : vector<8x128xf32>
    %c7_35 = arith.constant 7 : index
    %137 = memref.load %arg4[%c7_35] : memref<8xf32, #tpu.memory_space<smem>>
    %138 = vector.broadcast %137 : f32 to vector<8x128xf32>
    %139 = arith.mulf %107, %138 : vector<8x128xf32>
    %140 = arith.addf %136, %139 : vector<8x128xf32>
    %c1_36 = arith.constant 1 : index
    %141 = memref.load %arg5[%c1_36] : memref<2xf32, #tpu.memory_space<smem>>
    %142 = vector.broadcast %141 : f32 to vector<8x128xf32>
    %143 = arith.addf %140, %142 : vector<8x128xf32>
    %144 = arith.subf %143, %125 : vector<8x128xf32>
    %cst_37 = arith.constant 0.000000e+00 : f32
    %145 = vector.broadcast %cst_37 : f32 to vector<8x128xf32>
    %146 = arith.maximumf %144, %145 : vector<8x128xf32>
    %147 = math.absf %144 : vector<8x128xf32>
    %cst_38 = arith.constant 0.000000e+00 : f32
    %148 = vector.broadcast %cst_38 : f32 to vector<8x128xf32>
    %149 = arith.subf %148, %147 : vector<8x128xf32>
    %150 = math.exp %149 : vector<8x128xf32>
    %151 = math.log1p %150 : vector<8x128xf32>
    %152 = arith.addf %146, %151 : vector<8x128xf32>
    %cst_39 = arith.constant 0.000000e+00 : f32
    %153 = vector.broadcast %cst_39 : f32 to vector<8x128xf32>
    %154 = arith.subf %153, %152 : vector<8x128xf32>
    %c0_40 = arith.constant 0 : index
    %c0_41 = arith.constant 0 : index
    %c0_42 = arith.constant 0 : index
    %155 = vector.load %arg6[%c0_40, %c0_41, %c0_42] : memref<2x8x128xf32, #tpu.memory_space<vmem>>, vector<1x8x128xf32>
    %156 = vector.shape_cast %155 : vector<1x8x128xf32> to vector<8x128xf32>
    %157 = vector.shape_cast %154 : vector<8x128xf32> to vector<1x8x128xf32>
    tpu.vector_store %arg6[%c0_40, %c0_41, %c0_42], %157 {strides = array<i32>} : memref<2x8x128xf32, #tpu.memory_space<vmem>>, vector<1x8x128xf32>,
    %158 = arith.subf %144, %152 : vector<8x128xf32>
    %c1_43 = arith.constant 1 : index
    %c0_44 = arith.constant 0 : index
    %c0_45 = arith.constant 0 : index
    %159 = vector.load %arg6[%c1_43, %c0_44, %c0_45] : memref<2x8x128xf32, #tpu.memory_space<vmem>>, vector<1x8x128xf32>
    %160 = vector.shape_cast %159 : vector<1x8x128xf32> to vector<8x128xf32>
    %161 = vector.shape_cast %158 : vector<8x128xf32> to vector<1x8x128xf32>
    tpu.vector_store %arg6[%c1_43, %c0_44, %c0_45], %161 {strides = array<i32>} : memref<2x8x128xf32, #tpu.memory_space<vmem>>, vector<1x8x128xf32>,
    return
  }
  func.func @transform_0(%arg0: i32) -> (i32, i32, i32) {
    %c0_i32 = arith.constant 0 : i32
    %c0_i32_0 = arith.constant 0 : i32
    %c0_i32_1 = arith.constant 0 : i32
    return %c0_i32, %arg0, %c0_i32_0 : i32, i32, i32
  }
  func.func @transform_1(%arg0: i32) -> i32 {
    %c0_i32 = arith.constant 0 : i32
    %c0_i32_0 = arith.constant 0 : i32
    return %c0_i32 : i32
  }
  func.func @transform_2(%arg0: i32) -> i32 {
    %c0_i32 = arith.constant 0 : i32
    %c0_i32_0 = arith.constant 0 : i32
    return %c0_i32 : i32
  }
  func.func @transform_3(%arg0: i32) -> i32 {
    %c0_i32 = arith.constant 0 : i32
    %c0_i32_0 = arith.constant 0 : i32
    return %c0_i32 : i32
  }
  func.func @transform_4(%arg0: i32) -> i32 {
    %c0_i32 = arith.constant 0 : i32
    %c0_i32_0 = arith.constant 0 : i32
    return %c0_i32 : i32
  }
  func.func @transform_5(%arg0: i32) -> (i32, i32, i32) {
    %c0_i32 = arith.constant 0 : i32
    %c0_i32_0 = arith.constant 0 : i32
    %c0_i32_1 = arith.constant 0 : i32
    return %c0_i32, %arg0, %c0_i32_0 : i32, i32, i32
  }
}

</mosaic_0001>

<bundles_post_ra>
// kernel: qnetwork_forward_lane_major.1
= control target key start
LH: loop header
LB: loop body
LE: loop exit
PB: predicated region body
PF: predicated region fallthrough
CT: control target
= control target key end

     0   :  { %10 = vsyncpa [#allocation3], 0  ;;  %s421_s0 = inlined_call_operand.vmem [shape: f32[4,8,128], index: 0, kind: input, shape index: {}]   ;;  %s422_s1 = inlined_call_operand.vmem [shape: f32[16], index: 1, kind: input, shape index: {}]   ;;  %s423_s2 = inlined_call_operand.vmem [shape: f32[4], index: 2, kind: input, shape index: {}]   ;;  %s424_s3 = inlined_call_operand.vmem [shape: f32[8], index: 3, kind: input, shape index: {}]   ;;  %s425_s4 = inlined_call_operand.vmem [shape: f32[2], index: 4, kind: input, shape index: {}]   ;;  %s426_s5 = inlined_call_operand.vmem [shape: f32[2,8,128], index: 5, kind: output, shape index: {}]  }
   0x1   :  { %11 = vsyncpa [#allocation5], 0  ;;  %s29_s20 = sshll.u32 %s423_s2, 4  ;;  %s30_s20 = int_to_ptr.vmem [resolvable:$true] %s29_s20 }
   0x2   :  { %12 = vsyncpa [#allocation8], 0  ;;  %s20_s23 = sshll.u32 %s422_s1, 4  ;;  %s327_s24 = smov [#allocation4]   ;;  %s21_s23 = int_to_ptr.vmem [resolvable:$true] %s20_s23 }
   0x3   :  { %32 = dma.vmem_to_smem %s30_s20, 16, %s327_s24, [#allocation5]  }
   0x4   :  { %s328_s25 = smov [#allocation2]   ;;  %s38_s28 = sshll.u32 %s424_s3, 4  ;;  %s39_s28 = int_to_ptr.vmem [resolvable:$true] %s38_s28 }
   0x5   :  { %23 = dma.vmem_to_smem %s21_s23, 16, %s328_s25, [#allocation3]  }
   0x6   :  { %s47_s2 = sshll.u32 %s425_s4, 4  ;;  %s329_s6 = smov [#allocation6]   ;;  %s48_s2 = int_to_ptr.vmem [resolvable:$true] %s47_s2 }
   0x7   :  { %41 = dma.vmem_to_smem %s39_s28, 16, %s329_s6, [#allocation5]  }
   0x8   :  { %s330_s7 = smov [#allocation7]  }
   0x9   :  { %50 = dma.vmem_to_smem %s48_s2, 16, %s330_s7, [#allocation8]  }
   0xa   :  { %321 = dma.done.wait [#allocation3], 16  }
   0xb   :  { %322 = vsyncadd [#allocation3], 4294967280 }
   0xc   :  { %323 = dma.done.wait [#allocation5], 32  }
   0xd   :  { %324 = vsyncadd [#allocation5], 4294967264 }
   0xe   :  { %325 = dma.done.wait [#allocation8], 16  }
   0xf   :  { %326 = vsyncadd [#allocation8], 4294967280 }
  0x10   :  { %67 = sfence }
  0x11   :  { %s75_s1 = sld [smem:[#allocation2]]  ;;  %v68_v0 = vld [vmem:[%s421_s0] sm:$0xff]  ;;  %v227_v1 = vld [vmem:[%s421_s0 + $0x8] sm:$0xff]  ;;  %v384_v2 = vld [vmem:[%s421_s0 + $0x10] sm:$0xff] }
  0x12   :  { %s230_s8 = sld [smem:[#allocation2 + $0x4]]  ;;  %v389_v4 = vld [vmem:[%s421_s0 + $0x18] sm:$0xff] }
  0x13   :  { %s231_s3 = sld [smem:[#allocation2 + $0x8]] }
  0x14   :  { %s232_s9 = sld [smem:[#allocation2 + $0xc]] }
  0x15   :  { %s376_s4 = sld [smem:[#allocation4]] }
  0x16   :  { %s233_s14 = sld [smem:[#allocation2 + $0x1]] }
  0x17   :  { %v76_v3 = vstv %s75_s1  ;;  %s234_s17 = sld [smem:[#allocation2 + $0x5]] }
  0x18   :  { %v77_v5 = vmul.f32 %v76_v3, %v68_v0  ;;  %v79_v6 = vstv %s230_s8  ;;  %s235_s20 = sld [smem:[#allocation2 + $0x9]] }
  0x19   :  { %v80_v7 = vmul.f32 %v227_v1, %v79_v6  ;;  %v83_v8 = vstv %s231_s3  ;;  %s236_s21 = sld [smem:[#allocation2 + $0xd]] }
  0x1a   :  { %v84_v9 = vmul.f32 %v384_v2, %v83_v8  ;;  %v87_v10 = vstv %s232_s9  ;;  %s392_s22 = sld [smem:[#allocation4 + $0x1]] }
  0x1b   :  { %v81_v11 = vadd.f32 %v80_v7, %v77_v5  ;;  %v88_v12 = vmul.f32 %v389_v4, %v87_v10  ;;  %s238_s23 = sld [smem:[#allocation2 + $0x2]]  ;;  %v91_v17 = vstv %s376_s4 }
  0x1c   :  { %v98_v13 = vstv %s233_s14  ;;  %s239_s24 = sld [smem:[#allocation2 + $0x6]] }
  0x1d   :  { %v85_v14 = vadd.f32 %v84_v9, %v81_v11  ;;  %v99_v15 = vmul.f32 %v98_v13, %v68_v0  ;;  %v101_v16 = vstv %s234_s17  ;;  %s240_s0 = sld [smem:[#allocation2 + $0xa]] }
  0x1e   :  { %v102_v18 = vmul.f32 %v227_v1, %v101_v16  ;;  %v105_v19 = vstv %s235_s20  ;;  %s241_s25 = sld [smem:[#allocation2 + $0xe]] }
  0x1f   :  { %v89_v20 = vadd.f32 %v88_v12, %v85_v14  ;;  %v106_v21 = vmul.f32 %v384_v2, %v105_v19  ;;  %v109_v22 = vstv %s236_s21  ;;  %s397_s26 = sld [smem:[#allocation4 + $0x2]] }
  0x20   :  { %v103_v23 = vadd.f32 %v102_v18, %v99_v15  ;;  %v110_v24 = vmul.f32 %v389_v4, %v109_v22  ;;  %s243_s27 = sld [smem:[#allocation2 + $0x3]]  ;;  %v113_v31 = vstv %s392_s22 }
  0x21   :  { %v92_v25 = vadd.f32 %v91_v17, %v89_v20  ;;  %v120_v26 = vstv %s238_s23  ;;  %s244_s28 = sld [smem:[#allocation2 + $0x7]] }
  0x22   :  { %v107_v27 = vadd.f32 %v106_v21, %v103_v23  ;;  %v121_v28 = vmul.f32 %v120_v26, %v68_v0  ;;  %v123_v29 = vstv %s239_s24  ;;  %s245_s29 = sld [smem:[#allocation2 + $0xb]] }
  0x23   :  { %v93_v30 = vmul.f32 0.5, %v92_v25  ;;  %v124_v32 = vmul.f32 %v227_v1, %v123_v29  ;;  %v127_v33 = vstv %s240_s0  ;;  %s246_s30 = sld [smem:[#allocation2 + $0xf]] }
  0x24   :  { %v111_v34 = vadd.f32 %v110_v24, %v107_v27  ;;  %v128_v35 = vmul.f32 %v384_v2, %v127_v33  ;;  %v131_v36 = vstv %s241_s25  ;;  %s403_s2 = sld [smem:[#allocation4 + $0x3]] }
  0x25   :  { %261 = vtanh.f32 %v93_v30  ;;  %v125_v37 = vadd.f32 %v124_v32, %v121_v28  ;;  %v132_v38 = vmul.f32 %v389_v4, %v131_v36  ;;  %v135_v45 = vstv %s397_s26  ;;  %s406_s6 = sld [smem:[#allocation6]] }
  0x26   :  { %v114_v39 = vadd.f32 %v113_v31, %v111_v34  ;;  %v142_v40 = vstv %s243_s27  ;;  %s409_s7 = sld [smem:[#allocation6 + $0x2]] }
  0x27   :  { %v129_v41 = vadd.f32 %v128_v35, %v125_v37  ;;  %v143_v42 = vmul.f32 %v142_v40, %v68_v0  ;;  %v145_v43 = vstv %s244_s28  ;;  %s251_s1 = sld [smem:[#allocation6 + $0x1]] }
  0x28   :  { %v115_v44 = vmul.f32 0.5, %v114_v39  ;;  %v146_v46 = vmul.f32 %v227_v1, %v145_v43  ;;  %v149_v47 = vstv %s245_s29  ;;  %s252_s8 = sld [smem:[#allocation6 + $0x3]] }
  0x29   :  { %v133_v48 = vadd.f32 %v132_v38, %v129_v41  ;;  %v150_v49 = vmul.f32 %v384_v2, %v149_v47  ;;  %v153_v50 = vstv %s246_s30  ;;  %s249_s3 = sld [smem:[#allocation6 + $0x4]] }
  0x2a   :  { %263 = vtanh.f32 %v115_v44  ;;  %v147_v51 = vadd.f32 %v146_v46, %v143_v42  ;;  %v154_v52 = vmul.f32 %v389_v4, %v153_v50  ;;  %v157_v58 = vstv %s403_s2  ;;  %s253_s9 = sld [smem:[#allocation6 + $0x5]] }
  0x2b   :  { %v262_v53 = vpop.eup %261  ;;  %v136_v54 = vadd.f32 %v135_v45, %v133_v48  ;;  %v164_v0 = vstv %s406_s6  ;;  %s250_s10 = sld [smem:[#allocation6 + $0x6]] }
  0x2c   :  { %v151_v55 = vadd.f32 %v150_v49, %v147_v51  ;;  %v95_v56 = vadd.f32 1.0, %v262_v53  ;;  %v167_v2 = vstv %s409_s7  ;;  %s254_s11 = sld [smem:[#allocation6 + $0x7]] }
  0x2d   :  { %v137_v57 = vmul.f32 0.5, %v136_v54  ;;  %v182_v3 = vstv %s251_s1  ;;  %s178_s4 = sld [smem:[#allocation7]] }
  0x2e   :  { %v155_v59 = vadd.f32 %v154_v52, %v151_v55  ;;  %v96_v62 = vmul.f32 0.5, %v95_v56  ;;  %v185_v4 = vstv %s252_s8  ;;  %s255_s12 = sld [smem:[#allocation7 + $0x1]] }
  0x2f   :  { %265 = vtanh.f32 %v137_v57  ;;  %v171_v12 = vstv %s249_s3 }
  0x30   :  { %v264_v60 = vpop.eup %263  ;;  %v158_v61 = vadd.f32 %v157_v58, %v155_v59  ;;  %v165_v7 = vmul.f32 %v164_v0, %v96_v62  ;;  %v183_v9 = vmul.f32 %v182_v3, %v96_v62  ;;  %v189_v13 = vstv %s253_s9 }
  0x31   :  { %v117_v63 = vadd.f32 1.0, %v264_v60  ;;  %v175_v21 = vstv %s250_s10 }
  0x32   :  { %v159_v1 = vmul.f32 0.5, %v158_v61  ;;  %v193_v22 = vstv %s254_s11 }
  0x33   :  { %v118_v5 = vmul.f32 0.5, %v117_v63  ;;  %v179_v28 = vstv %s178_s4 }
  0x34   :  { %267 = vtanh.f32 %v159_v1  ;;  %v197_v29 = vstv %s255_s12 }
  0x35   :  { %v266_v6 = vpop.eup %265  ;;  %v168_v8 = vmul.f32 %v167_v2, %v118_v5  ;;  %v186_v10 = vmul.f32 %v185_v4, %v118_v5 }
  0x36   :  { %v139_v11 = vadd.f32 1.0, %v266_v6 }
  0x37   :  { %v169_v15 = vadd.f32 %v168_v8, %v165_v7  ;;  %v187_v16 = vadd.f32 %v186_v10, %v183_v9 }
  0x38   :  { %v140_v14 = vmul.f32 0.5, %v139_v11 }
  0x3a   :  { %v268_v17 = vpop.eup %267  ;;  %v172_v18 = vmul.f32 %v171_v12, %v140_v14  ;;  %v190_v19 = vmul.f32 %v189_v13, %v140_v14 }
  0x3b   :  { %v161_v20 = vadd.f32 1.0, %v268_v17 }
  0x3c   :  { %v173_v24 = vadd.f32 %v172_v18, %v169_v15  ;;  %v191_v25 = vadd.f32 %v190_v19, %v187_v16 }
  0x3d   :  { %v162_v23 = vmul.f32 0.5, %v161_v20 }
  0x3f   :  { %v176_v26 = vmul.f32 %v175_v21, %v162_v23  ;;  %v194_v27 = vmul.f32 %v193_v22, %v162_v23 }
  0x41   :  { %v177_v30 = vadd.f32 %v176_v26, %v173_v24  ;;  %v195_v31 = vadd.f32 %v194_v27, %v191_v25 }
  0x43   :  { %v180_v32 = vadd.f32 %v179_v28, %v177_v30  ;;  %v198_v33 = vadd.f32 %v197_v29, %v195_v31 }
  0x45   :  { %v199_v34 = vsub.f32 %v198_v33, %v180_v32 }
  0x47   :  { %v201_v35 = vand.u32 2147483647, %v199_v34  ;;  %v200_v45 = vmax.f32 %v199_v34, 0.0 }
  0x49   :  { %v202_v36 = vsub.f32 0.0, %v201_v35 }
  0x4b   :  { %v203_v37 = vmul.f32 1.442695, %v202_v36 }
  0x4d   :  { %269 = vpow2.f32 %v203_v37 }
  0x53   :  { %v270_v38 = vpop.eup %269 }
  0x54   :  { %v205_v39 = vadd.f32 1.0, %v270_v38  ;;  %v208_v40 = vmul.f32 -0.5, %v270_v38  ;;  %v211_v42 = vand.u32 2147483647, %v270_v38 }
  0x56   :  { %271 = vlog2.f32 %v205_v39  ;;  %v209_v41 = vadd.f32 1.0, %v208_v40  ;;  %vm212_vm0 = vcmp.lt.f32.partialorder %v211_v42, 0.0004427343 }
  0x58   :  { %v210_v43 = vmul.f32 %v270_v38, %v209_v41 }
  0x5c   :  { %v272_v44 = vpop.eup %271 }
  0x5d   :  { %v207_v46 = vmul.f32 0.6931472, %v272_v44 }
  0x5f   :  { %v213_v47 = vsel %vm212_vm0, %v210_v43, %v207_v46 }
  0x60   :  { %v214_v48 = vadd.f32 %v213_v47, %v200_v45 }
  0x62   :  { %v215_v49 = vsub.f32 0.0, %v214_v48  ;;  %v217_v50 = vsub.f32 %v199_v34, %v214_v48 }
  0x64   :  { %216 = vst [vmem:[%s426_s5] sm:$0xff] %v215_v49 }
  0x65   :  { %256 = vst [vmem:[%s426_s5 + $0x8] sm:$0xff] %v217_v50 }
  0x66   :  { %224 = vsyncpa [#allocation3], 1 }
  0x67   :  { %225 = vsyncpa [#allocation5], 1 }
  0x68   :  { %226 = vsyncpa [#allocation8], 1 }

</bundles_post_ra>
